<compile_context>
chip_gen: v6e
topology: v6e:2x2x1
jax: 0.10.0
libtpu: 0.0.40
codegen_flags: <defaults>
</compile_context>

<pallas_src>
import functools

import jax
import jax.numpy as jnp
from jax.experimental import pallas as pl
from jax.experimental.pallas import tpu as pltpu


def _pinn_kernel(x_ref, *refs, num_linear):
    """Whole-MLP forward for one [features, block_batch] tile.

    refs = (w0, b0, w1, b1, ..., w_{L-1}, b_{L-1}, out_ref)
    SiLU after every linear except the last one (matches nn.Sequential).
    """
    param_refs = refs[:-1]
    o_ref = refs[-1]

    h = x_ref[...]  # [num_inputs, block_batch], f32
    for li in range(num_linear):
        w = param_refs[2 * li][...]        # [out, in]
        b = param_refs[2 * li + 1][...]    # [out, 1]
        h = jnp.dot(w, h, preferred_element_type=jnp.float32) + b
        if li != num_linear - 1:
            # SiLU(x) = x * sigmoid(x)  (exp goes to the EUP slot)
            h = h * jax.nn.sigmoid(h)
    o_ref[...] = h.astype(o_ref.dtype)     # [num_outputs, block_batch]


def pinn_forward(x, weights, biases, *, block_batch=4096):
    """Run the full PINN MLP inside a single pallas_call, tiled over batch.

    x:       [batch, num_inputs]
    weights: list of [out_features, in_features]  (PyTorch layout)
    biases:  list of [out_features, 1]
    returns  [batch, num_outputs]
    """
    B, num_inputs = x.shape
    num_linear = len(weights)
    num_outputs = weights[-1].shape[0]

    # Single grid step for small batches; otherwise require lane-aligned tiles.
    block_batch = min(block_batch, B)
    if block_batch < B:
        assert B % block_batch == 0, "batch must be divisible by block_batch"
        assert block_batch % 128 == 0, "block_batch must be a multiple of 128"

    x_t = x.T  # [num_inputs, B] -- feature-major; batch lands on lanes.

    in_specs = [pl.BlockSpec((num_inputs, block_batch), lambda i: (0, i))]
    args = [x_t]
    for w, b in zip(weights, biases):
        # Weights/biases are tiny: full array resident every grid step.
        in_specs.append(pl.BlockSpec(w.shape, lambda i: (0, 0)))
        in_specs.append(pl.BlockSpec(b.shape, lambda i: (0, 0)))
        args += [w, b]

    kernel = functools.partial(_pinn_kernel, num_linear=num_linear)

    out_t = pl.pallas_call(
        kernel,
        out_shape=jax.ShapeDtypeStruct((num_outputs, B), x.dtype),
        grid_spec=pltpu.PrefetchScalarGridSpec(
            num_scalar_prefetch=0,
            grid=(B // block_batch,),
            in_specs=in_specs,
            out_specs=pl.BlockSpec((num_outputs, block_batch), lambda i: (0, i)),
        ),
        compiler_params=pltpu.CompilerParams(
            dimension_semantics=("parallel",)),
    )(*args)

    return out_t.T  # back to [batch, num_outputs] to match the PyTorch module


def init_pinn_params(key, num_inputs, num_layers, num_neurons, num_outputs):
    """Xavier-normal weights (as in torch.nn.init.xavier_normal_), zero biases.

    Weights stored as [out_features, in_features] (PyTorch layout),
    biases as [out_features, 1].
    """
    dims = [num_inputs] + [num_neurons] * (num_layers + 1) + [num_outputs]
    weights, biases = [], []
    for fan_in, fan_out in zip(dims[:-1], dims[1:]):
        key, sub = jax.random.split(key)
        std = (2.0 / (fan_in + fan_out)) ** 0.5
        w = std * jax.random.normal(sub, (fan_out, fan_in), dtype=jnp.float32)
        b = jnp.zeros((fan_out, 1), dtype=jnp.float32)
        weights.append(w)
        biases.append(b)
    return weights, biases


def pinn_reference(x, weights, biases):
    """Pure-JAX reference of the same MLP for a correctness check."""
    h = x
    for li, (w, b) in enumerate(zip(weights, biases)):
        h = h @ w.T + b.T
        if li != len(weights) - 1:
            h = h * jax.nn.sigmoid(h)
    return h


if __name__ == "__main__":
    # Small PINN config: (x, y, t) -> scalar field, 2 hidden blocks of 32.
    num_inputs, num_layers, num_neurons, num_outputs = 3, 2, 32, 1
    batch = 128

    key = jax.random.PRNGKey(0)
    key, kx = jax.random.split(key)
    x = jax.random.normal(kx, (batch, num_inputs), dtype=jnp.float32)

    weights, biases = init_pinn_params(
        key, num_inputs, num_layers, num_neurons, num_outputs)

    # Demo batch (128) collapses to a single grid step (block_batch clamped).
    out = pinn_forward(x, weights, biases, block_batch=4096)
    out = jax.block_until_ready(out)

    ref = pinn_reference(x, weights, biases)
    assert out.shape == (batch, num_outputs)
    assert jnp.allclose(out, ref, atol=1e-5, rtol=1e-5)

    print("KERNEL_OK")
</pallas_src>

<mosaic_0001>
module attributes {stable_mosaic.version = 11 : i64} {
  func.func @_pinn_kernel(%arg0: i32, %arg1: memref<3x128xf32, #tpu.memory_space<vmem>>, %arg2: memref<32x3xf32, #tpu.memory_space<vmem>>, %arg3: memref<32x1xf32, #tpu.memory_space<vmem>>, %arg4: memref<32x32xf32, #tpu.memory_space<vmem>>, %arg5: memref<32x1xf32, #tpu.memory_space<vmem>>, %arg6: memref<32x32xf32, #tpu.memory_space<vmem>>, %arg7: memref<32x1xf32, #tpu.memory_space<vmem>>, %arg8: memref<1x32xf32, #tpu.memory_space<vmem>>, %arg9: memref<1x1xf32, #tpu.memory_space<vmem>>, %arg10: memref<1x128xf32, #tpu.memory_space<vmem>>) attributes {dimension_semantics = [#tpu.dimension_semantics<parallel>], iteration_bounds = array<i64: 1>, scalar_prefetch = 0 : i64, scratch_operands = 0 : i64, tpu.core_type = #tpu.core_type<tc>, window_params = [{transform_indices = @transform_0, window_bounds = array<i64: 3, 128>}, {pipeline_mode = #tpu.pipeline_mode<synchronous>, transform_indices = @transform_1, window_bounds = array<i64: 32, 3>}, {pipeline_mode = #tpu.pipeline_mode<synchronous>, transform_indices = @transform_2, window_bounds = array<i64: 32, 1>}, {pipeline_mode = #tpu.pipeline_mode<synchronous>, transform_indices = @transform_3, window_bounds = array<i64: 32, 32>}, {pipeline_mode = #tpu.pipeline_mode<synchronous>, transform_indices = @transform_4, window_bounds = array<i64: 32, 1>}, {pipeline_mode = #tpu.pipeline_mode<synchronous>, transform_indices = @transform_5, window_bounds = array<i64: 32, 32>}, {pipeline_mode = #tpu.pipeline_mode<synchronous>, transform_indices = @transform_6, window_bounds = array<i64: 32, 1>}, {pipeline_mode = #tpu.pipeline_mode<synchronous>, transform_indices = @transform_7, window_bounds = array<i64: 1, 32>}, {pipeline_mode = #tpu.pipeline_mode<synchronous>, transform_indices = @transform_8, window_bounds = array<i64: 1, 1>}, {transform_indices = @transform_9, window_bounds = array<i64: 1, 128>}]} {
    %c0 = arith.constant 0 : index
    %c0_0 = arith.constant 0 : index
    %0 = vector.load %arg1[%c0, %c0_0] : memref<3x128xf32, #tpu.memory_space<vmem>>, vector<3x128xf32>
    %c0_1 = arith.constant 0 : index
    %c0_2 = arith.constant 0 : index
    %1 = vector.load %arg2[%c0_1, %c0_2] : memref<32x3xf32, #tpu.memory_space<vmem>>, vector<32x3xf32>
    %c0_3 = arith.constant 0 : index
    %c0_4 = arith.constant 0 : index
    %2 = vector.load %arg3[%c0_3, %c0_4] : memref<32x1xf32, #tpu.memory_space<vmem>>, vector<32x1xf32>
    %cst = arith.constant dense<0.000000e+00> : vector<32x128xf32>
    %3 = tpu.matmul %1, %0, %cst {dimension_numbers = #tpu.dot_dimension_numbers<[1], [0], [0], [1], [0, 0, 1, 1], [], []>} : vector<32x3xf32>, vector<3x128xf32>, vector<32x128xf32> -> vector<32x128xf32>
    %4 = vector.broadcast %2 : vector<32x1xf32> to vector<32x128xf32>
    %5 = arith.addf %3, %4 : vector<32x128xf32>
    %6 = arith.negf %5 : vector<32x128xf32>
    %7 = math.exp %6 : vector<32x128xf32>
    %cst_5 = arith.constant 1.000000e+00 : f32
    %8 = vector.broadcast %cst_5 : f32 to vector<32x128xf32>
    %9 = arith.addf %8, %7 : vector<32x128xf32>
    %10 = arith.divf %8, %9 : vector<32x128xf32>
    %11 = arith.mulf %5, %10 : vector<32x128xf32>
    %c0_6 = arith.constant 0 : index
    %c0_7 = arith.constant 0 : index
    %12 = vector.load %arg4[%c0_6, %c0_7] : memref<32x32xf32, #tpu.memory_space<vmem>>, vector<32x32xf32>
    %c0_8 = arith.constant 0 : index
    %c0_9 = arith.constant 0 : index
    %13 = vector.load %arg5[%c0_8, %c0_9] : memref<32x1xf32, #tpu.memory_space<vmem>>, vector<32x1xf32>
    %cst_10 = arith.constant dense<0.000000e+00> : vector<32x128xf32>
    %14 = tpu.matmul %12, %11, %cst_10 {dimension_numbers = #tpu.dot_dimension_numbers<[1], [0], [0], [1], [0, 0, 1, 1], [], []>} : vector<32x32xf32>, vector<32x128xf32>, vector<32x128xf32> -> vector<32x128xf32>
    %15 = vector.broadcast %13 : vector<32x1xf32> to vector<32x128xf32>
    %16 = arith.addf %14, %15 : vector<32x128xf32>
    %17 = arith.negf %16 : vector<32x128xf32>
    %18 = math.exp %17 : vector<32x128xf32>
    %cst_11 = arith.constant 1.000000e+00 : f32
    %19 = vector.broadcast %cst_11 : f32 to vector<32x128xf32>
    %20 = arith.addf %19, %18 : vector<32x128xf32>
    %21 = arith.divf %19, %20 : vector<32x128xf32>
    %22 = arith.mulf %16, %21 : vector<32x128xf32>
    %c0_12 = arith.constant 0 : index
    %c0_13 = arith.constant 0 : index
    %23 = vector.load %arg6[%c0_12, %c0_13] : memref<32x32xf32, #tpu.memory_space<vmem>>, vector<32x32xf32>
    %c0_14 = arith.constant 0 : index
    %c0_15 = arith.constant 0 : index
    %24 = vector.load %arg7[%c0_14, %c0_15] : memref<32x1xf32, #tpu.memory_space<vmem>>, vector<32x1xf32>
    %cst_16 = arith.constant dense<0.000000e+00> : vector<32x128xf32>
    %25 = tpu.matmul %23, %22, %cst_16 {dimension_numbers = #tpu.dot_dimension_numbers<[1], [0], [0], [1], [0, 0, 1, 1], [], []>} : vector<32x32xf32>, vector<32x128xf32>, vector<32x128xf32> -> vector<32x128xf32>
    %26 = vector.broadcast %24 : vector<32x1xf32> to vector<32x128xf32>
    %27 = arith.addf %25, %26 : vector<32x128xf32>
    %28 = arith.negf %27 : vector<32x128xf32>
    %29 = math.exp %28 : vector<32x128xf32>
    %cst_17 = arith.constant 1.000000e+00 : f32
    %30 = vector.broadcast %cst_17 : f32 to vector<32x128xf32>
    %31 = arith.addf %30, %29 : vector<32x128xf32>
    %32 = arith.divf %30, %31 : vector<32x128xf32>
    %33 = arith.mulf %27, %32 : vector<32x128xf32>
    %c0_18 = arith.constant 0 : index
    %c0_19 = arith.constant 0 : index
    %34 = vector.load %arg8[%c0_18, %c0_19] : memref<1x32xf32, #tpu.memory_space<vmem>>, vector<1x32xf32>
    %c0_20 = arith.constant 0 : index
    %c0_21 = arith.constant 0 : index
    %35 = vector.load %arg9[%c0_20, %c0_21] : memref<1x1xf32, #tpu.memory_space<vmem>>, vector<1x1xf32>
    %cst_22 = arith.constant dense<0.000000e+00> : vector<1x128xf32>
    %36 = tpu.matmul %34, %33, %cst_22 {dimension_numbers = #tpu.dot_dimension_numbers<[1], [0], [0], [1], [0, 0, 1, 1], [], []>} : vector<1x32xf32>, vector<32x128xf32>, vector<1x128xf32> -> vector<1x128xf32>
    %37 = vector.broadcast %35 : vector<1x1xf32> to vector<1x128xf32>
    %38 = arith.addf %36, %37 : vector<1x128xf32>
    %c0_23 = arith.constant 0 : index
    %c0_24 = arith.constant 0 : index
    %39 = vector.load %arg10[%c0_23, %c0_24] : memref<1x128xf32, #tpu.memory_space<vmem>>, vector<1x128xf32>
    tpu.vector_store %arg10[%c0_23, %c0_24], %38 {strides = array<i32>} : memref<1x128xf32, #tpu.memory_space<vmem>>, vector<1x128xf32>,
    return
  }
  func.func @transform_0(%arg0: i32) -> (i32, i32) {
    %c0_i32 = arith.constant 0 : i32
    %c0_i32_0 = arith.constant 0 : i32
    return %c0_i32, %arg0 : i32, i32
  }
  func.func @transform_1(%arg0: i32) -> (i32, i32) {
    %c0_i32 = arith.constant 0 : i32
    %c0_i32_0 = arith.constant 0 : i32
    %c0_i32_1 = arith.constant 0 : i32
    return %c0_i32, %c0_i32_0 : i32, i32
  }
  func.func @transform_2(%arg0: i32) -> (i32, i32) {
    %c0_i32 = arith.constant 0 : i32
    %c0_i32_0 = arith.constant 0 : i32
    %c0_i32_1 = arith.constant 0 : i32
    return %c0_i32, %c0_i32_0 : i32, i32
  }
  func.func @transform_3(%arg0: i32) -> (i32, i32) {
    %c0_i32 = arith.constant 0 : i32
    %c0_i32_0 = arith.constant 0 : i32
    %c0_i32_1 = arith.constant 0 : i32
    return %c0_i32, %c0_i32_0 : i32, i32
  }
  func.func @transform_4(%arg0: i32) -> (i32, i32) {
    %c0_i32 = arith.constant 0 : i32
    %c0_i32_0 = arith.constant 0 : i32
    %c0_i32_1 = arith.constant 0 : i32
    return %c0_i32, %c0_i32_0 : i32, i32
  }
  func.func @transform_5(%arg0: i32) -> (i32, i32) {
    %c0_i32 = arith.constant 0 : i32
    %c0_i32_0 = arith.constant 0 : i32
    %c0_i32_1 = arith.constant 0 : i32
    return %c0_i32, %c0_i32_0 : i32, i32
  }
  func.func @transform_6(%arg0: i32) -> (i32, i32) {
    %c0_i32 = arith.constant 0 : i32
    %c0_i32_0 = arith.constant 0 : i32
    %c0_i32_1 = arith.constant 0 : i32
    return %c0_i32, %c0_i32_0 : i32, i32
  }
  func.func @transform_7(%arg0: i32) -> (i32, i32) {
    %c0_i32 = arith.constant 0 : i32
    %c0_i32_0 = arith.constant 0 : i32
    %c0_i32_1 = arith.constant 0 : i32
    return %c0_i32, %c0_i32_0 : i32, i32
  }
  func.func @transform_8(%arg0: i32) -> (i32, i32) {
    %c0_i32 = arith.constant 0 : i32
    %c0_i32_0 = arith.constant 0 : i32
    %c0_i32_1 = arith.constant 0 : i32
    return %c0_i32, %c0_i32_0 : i32, i32
  }
  func.func @transform_9(%arg0: i32) -> (i32, i32) {
    %c0_i32 = arith.constant 0 : i32
    %c0_i32_0 = arith.constant 0 : i32
    return %c0_i32, %arg0 : i32, i32
  }
}

</mosaic_0001>

<bundles_post_ra>
// kernel: tpu_custom_call.1
= control target key start
LH: loop header
LB: loop body
LE: loop exit
PB: predicated region body
PF: predicated region fallthrough
CT: control target
= control target key end

     0   :  { %s926_s0 = inlined_call_operand.vmem [shape: f32[3,128], index: 0, kind: input, shape index: {}]   ;;  %s927_s1 = inlined_call_operand.vmem [shape: f32[32,3], index: 1, kind: input, shape index: {}]   ;;  %s928_s2 = inlined_call_operand.vmem [shape: f32[32,1], index: 2, kind: input, shape index: {}]   ;;  %s929_s3 = inlined_call_operand.vmem [shape: f32[32,32], index: 3, kind: input, shape index: {}]   ;;  %s930_s4 = inlined_call_operand.vmem [shape: f32[32,1], index: 4, kind: input, shape index: {}]   ;;  %s931_s5 = inlined_call_operand.vmem [shape: f32[32,32], index: 5, kind: input, shape index: {}]   ;;  %s932_s6 = inlined_call_operand.vmem [shape: f32[32,1], index: 6, kind: input, shape index: {}]   ;;  %s933_s7 = inlined_call_operand.vmem [shape: f32[1,32], index: 7, kind: input, shape index: {}]   ;;  %s934_s8 = inlined_call_operand.<no memory space> [shape: f32[1,1], index: 8, kind: input, shape index: {}]   ;;  %s935_s9 = inlined_call_operand.hbm [shape: f32[1,128], index: 9, kind: output, shape index: {}]  }
   0x1   :  { %v14_v0 = vstv %s934_s8 }
   0x2   :  { %15 = vst [vmem:[#allocation2] sm:$0x1] %v14_v0 }
   0x3   :  { %v35_v1 = vld [vmem:[%s926_s0] sm:$0x7]  ;;  %vm77_vm0 = vcmask 1042432   ;;  %vm64_vm1 = vcmask 23552   ;;  %v37_v3 = vld [vmem:[%s927_s1 + $0x8] sm:$0xff]  ;;  %v38_v4 = vld [vmem:[%s927_s1 + $0x10] sm:$0xff] }
   0x4   :  { %v36_v2 = vld [vmem:[%s927_s1] sm:$0xff]  ;;  %652 = vmatprep.subr.msk.mxu0 %vm77_vm0, %v35_v1  ;;  %v43_v5 = vld [vmem:[%s928_s2 + $0x18] sm:$0xff]  ;;  %v775_v6 = vmov 0   ;;  %v41_v7 = vld [vmem:[%s928_s2 + $0x8] sm:$0xff] }
   0x5   :  { %654 = vmatprep.mubr.msk.f32.mxu0 %vm64_vm1, %v36_v2  ;;  %653 = vmatpush3.msk.msra.mxu0 %vm77_vm0, %v35_v1  ;;  %v39_v8 = vld [vmem:[%s927_s1 + $0x18] sm:$0xff]  ;;  %v42_v9 = vld [vmem:[%s928_s2 + $0x10] sm:$0xff]  ;;  %v40_v10 = vld [vmem:[%s928_s2] sm:$0xff] }
   0x6   :  { %703 = vset.pattern.permute.xlu0 %v775_v6  ;;  %655 = vmatmul.mubr.msk.f32.vlgmr.msra.gmra.mxu0 %vm64_vm1, %v37_v3 }
   0x7   :  { %61 = vperm.xlu0 %703, %v43_v5   ;;  %657 = vmatprep.mubr.msk.f32.mxu0 %vm64_vm1, %v38_v4 }
   0x8   :  { %704 = vset.pattern.permute.xlu1 %v775_v6 }
   0x9   :  { %51 = vperm.xlu1 %704, %v41_v7  }
   0xa   :  { %16 = vsyncpa [#allocation4], 0  ;;  %658 = vmatmul.mubr.msk.f32.gmra.mxu0 %vm64_vm1, %v39_v8  ;;  %v201_v11 = vld [vmem:[%s930_s4 + $0x18] sm:$0xff]  ;;  %v200_v12 = vld [vmem:[%s930_s4 + $0x10] sm:$0xff]  ;;  %vm222_vm2 = vcmask 261120   ;;  %vm777_vm3 = vmmov 0  }
   0xb   :  { %56 = vperm.xlu0 %703, %v42_v9   ;;  %v199_v13 = vld [vmem:[%s930_s4 + $0x8] sm:$0xff]  ;;  %v198_v14 = vld [vmem:[%s930_s4] sm:$0xff]  ;;  %v355_v15 = vld [vmem:[%s932_s6 + $0x18] sm:$0xff]  ;;  %s778_s10 = smov [#allocation3]  }
   0xc   :  { %v354_v16 = vld [vmem:[%s932_s6 + $0x10] sm:$0xff]  ;;  %v353_v17 = vld [vmem:[%s932_s6 + $0x8] sm:$0xff]  ;;  %v352_v18 = vld [vmem:[%s932_s6] sm:$0xff]  ;;  %s592_s2 = sshll.u32 %s778_s10, 4  ;;  %s593_s2 = int_to_ptr.vmem [resolvable:$true] %s592_s2 }
   0xd   :  { %46 = vperm.xlu1 %704, %v40_v10   ;;  %v502_v19 = vld [vmem:[#allocation2] sm:$0x1]  ;;  %v195_v53 = vld [vmem:[%s929_s3 + $0x8] sm:$0xff]  ;;  %v196_v54 = vld [vmem:[%s929_s3 + $0x10] sm:$0xff]  ;;  %s753_s11 = scalar_lea.vmem %s593_s2, 16  ;;  %s757_s12 = scalar_lea.vmem %s593_s2, 32 }
   0xe   :  { %v194_v20 = vld [vmem:[%s929_s3] sm:$0xff]  ;;  %v197_v55 = vld [vmem:[%s929_s3 + $0x18] sm:$0xff]  ;;  %p754_p0 = scmp.ne.s32.totalorder %s593_s2, %s753_s11  ;;  %p758_p1 = scmp.lt.s32.totalorder %s593_s2, %s593_s2 }
   0xf   :  { %219 = vperm.xlu0 %703, %v201_v11   ;;  %668 = vmatprep.mubr.msk.f32.mxu1 %vm222_vm2, %v194_v20  ;;  %v348_v56 = vld [vmem:[%s931_s5] sm:$0xff]  ;;  %p759_p2 = scmp.lt.s32.totalorder %s757_s12, %s753_s11 }
  0x10   :  { %682 = vmatprep.mubr.msk.f32.mxu0 %vm222_vm2, %v348_v56 }
  0x11   :  { %214 = vperm.xlu1 %704, %v200_v12   ;;  %p760_p3 = por %p759_p2, %p758_p1 }
  0x13   :  { %209 = vperm.xlu0 %703, %v199_v13   ;;  %p761_p4 = pnand %p760_p3, %p754_p0 }
  0x15   :  { %204 = vperm.xlu1 %704, %v198_v14  }
  0x17   :  { %373 = vperm.xlu0 %703, %v355_v15  }
  0x19   :  { %368 = vperm.xlu1 %704, %v354_v16  }
  0x1b   :  { %363 = vperm.xlu0 %703, %v353_v17  }
  0x1d   :  { %358 = vperm.xlu1 %704, %v352_v18  }
  0x1f   :  { %505 = vperm.xlu0 %703, %v502_v19  }
  0x82   :  { %v62_v22 = vpop.permute.xlu0 %61 }
  0x84   :  { %v52_v21 = vpop.permute.xlu1 %51 }
  0x86   :  { %v57_v32 = vpop.permute.xlu0 %56 }
  0x88   :  { %v47_v25 = vpop.permute.xlu1 %46 }
  0x8a   :  { %v220_v57 = vpop.permute.xlu0 %219 }
  0x8c   :  { %v215_v58 = vpop.permute.xlu1 %214 }
  0x8e   :  { %v210_v59 = vpop.permute.xlu0 %209 }
  0x90   :  { %v205_v62 = vpop.permute.xlu1 %204 }
  0xc6   :  { %v656_v23 = vpop.f32.mrf.mxu0 }
  0xc7   :  { %v153_v24 = vadd.f32 %v656_v23, %v52_v21 }
  0xc8   :  { %v147_v26 = vpop.f32.mrf.mxu0 }
  0xc9   :  { %v606_v27 = vmul.f32 -1.442695, %v153_v24  ;;  %v148_v28 = vadd.f32 %v147_v26, %v47_v25  ;;  %v349_v25 = vld [vmem:[%s931_s5 + $0x8] sm:$0xff]  ;;  %v350_v26 = vld [vmem:[%s931_s5 + $0x10] sm:$0xff] }
  0xca   :  { %v659_v29 = vpop.f32.mrf.mxu0 }
  0xcb   :  { %v605_v30 = vmul.f32 -1.442695, %v148_v28  ;;  %v163_v31 = vadd.f32 %v659_v29, %v62_v22  ;;  %705 = vpow2.f32 %v606_v27  ;;  %v351_v27 = vld [vmem:[%s931_s5 + $0x18] sm:$0xff]  ;;  %v374_v29 = vpop.permute.xlu0 %373 }
  0xcc   :  { %v157_v33 = vpop.f32.mrf.mxu0 }
  0xcd   :  { %v608_v34 = vmul.f32 -1.442695, %v163_v31  ;;  %v158_v35 = vadd.f32 %v157_v33, %v57_v32  ;;  %707 = vpow2.f32 %v605_v30  ;;  %v369_v30 = vpop.permute.xlu1 %368 }
  0xcf   :  { %709 = vpow2.f32 %v608_v34  ;;  %v607_v36 = vmul.f32 -1.442695, %v158_v35 }
  0xd1   :  { %711 = vpow2.f32 %v607_v36  ;;  %v359_v34 = vpop.permute.xlu1 %358 }
  0xd8   :  { %v706_v37 = vpop.eup %705 }
  0xd9   :  { %v179_v40 = vadd.f32 1.0, %v706_v37 }
  0xda   :  { %v708_v38 = vpop.eup %707 }
  0xdb   :  { %v178_v43 = vadd.f32 1.0, %v708_v38 }
  0xdc   :  { %v710_v39 = vpop.eup %709 }
  0xdd   :  { %v181_v41 = vadd.f32 1.0, %v710_v39 }
  0xde   :  { %v712_v42 = vpop.eup %711 }
  0xdf   :  { %713 = vrcp.f32 %v181_v41  ;;  %v180_v44 = vadd.f32 1.0, %v712_v42 }
  0xe0   :  { %715 = vrcp.f32 %v179_v40 }
  0xe1   :  { %717 = vrcp.f32 %v180_v44 }
  0xe2   :  { %719 = vrcp.f32 %v178_v43 }
  0xec   :  { %v714_v45 = vpop.eup %713 }
  0xed   :  { %v716_v46 = vpop.eup %715  ;;  %v193_v47 = vmul.f32 %v714_v45, %v163_v31  ;;  %v364_v31 = vpop.permute.xlu0 %363 }
  0xee   :  { %v718_v48 = vpop.eup %717  ;;  %v191_v51 = vmul.f32 %v716_v46, %v153_v24 }
  0xef   :  { %v192_v49 = vmul.f32 %v718_v48, %v158_v35  ;;  %660 = vmatprep.subr.mxu1 %v193_v47  ;;  %v720_v50 = vpop.eup %719 }
  0xf0   :  { %661 = vmatpush3.msra.mxu1 %v193_v47  ;;  %v190_v52 = vmul.f32 %v720_v50, %v148_v28  ;;  %v776_v28 = vmov 0.0  }
  0xf1   :  { %662 = vmatprep.subr.mxu1 %v192_v49 }
  0xf2   :  { %663 = vmatpush3.msra.mxu1 %v192_v49 }
  0xf3   :  { %664 = vmatprep.subr.mxu1 %v191_v51 }
  0xf4   :  { %665 = vmatpush3.msra.mxu1 %v191_v51 }
  0xf5   :  { %666 = vmatprep.subr.mxu1 %v190_v52 }
  0xf6   :  { %667 = vmatpush3.msra.mxu1 %v190_v52 }
  0xf7   :  { %669 = vmatmul.mubr.msk.f32.vlgmr.msra.gmra.mxu1 %vm222_vm2, %v195_v53  ;;  %688 = vmatprep.subr.mxu1 %v776_v28 }
  0xf8   :  { %671 = vmatprep.mubr.msk.f32.mxu1 %vm222_vm2, %v196_v54 }
  0xfb   :  { %672 = vmatmul.mubr.msk.f32.gmra.mxu1 %vm222_vm2, %v197_v55 }
  0xfc   :  { %696 = vmatprep.mubr.msk.f32.mxu1 %vm777_vm3, %v776_v28 }
 0x1b7   :  { %v670_v60 = vpop.f32.mrf.mxu1 }
 0x1b8   :  { %v307_v61 = vadd.f32 %v670_v60, %v210_v59 }
 0x1b9   :  { %v301_v63 = vpop.f32.mrf.mxu1 }
 0x1ba   :  { %v614_v0 = vmul.f32 -1.442695, %v307_v61  ;;  %v302_v1 = vadd.f32 %v301_v63, %v205_v62  ;;  %v508_v62 = vlaneseq }
 0x1bb   :  { %v673_v2 = vpop.f32.mrf.mxu1 }
 0x1bc   :  { %v613_v3 = vmul.f32 -1.442695, %v302_v1  ;;  %v317_v4 = vadd.f32 %v673_v2, %v220_v57  ;;  %721 = vpow2.f32 %v614_v0  ;;  %v509_v63 = vshrl.u32 %v508_v62, 7 }
 0x1bd   :  { %v311_v5 = vpop.f32.mrf.mxu1 }
 0x1be   :  { %v616_v6 = vmul.f32 -1.442695, %v317_v4  ;;  %v312_v7 = vadd.f32 %v311_v5, %v215_v58  ;;  %723 = vpow2.f32 %v613_v3  ;;  %v510_v0 = vsub.s32 0, %v509_v63 }
 0x1c0   :  { %725 = vpow2.f32 %v616_v6  ;;  %v615_v8 = vmul.f32 -1.442695, %v312_v7 }
 0x1c2   :  { %727 = vpow2.f32 %v615_v8 }
 0x1c9   :  { %v722_v9 = vpop.eup %721 }
 0x1ca   :  { %v333_v12 = vadd.f32 1.0, %v722_v9 }
 0x1cb   :  { %v724_v10 = vpop.eup %723 }
 0x1cc   :  { %v332_v15 = vadd.f32 1.0, %v724_v10 }
 0x1cd   :  { %v726_v11 = vpop.eup %725 }
 0x1ce   :  { %v335_v13 = vadd.f32 1.0, %v726_v11 }
 0x1cf   :  { %v728_v14 = vpop.eup %727 }
 0x1d0   :  { %729 = vrcp.f32 %v335_v13  ;;  %v334_v16 = vadd.f32 1.0, %v728_v14 }
 0x1d1   :  { %731 = vrcp.f32 %v333_v12 }
 0x1d2   :  { %733 = vrcp.f32 %v334_v16 }
 0x1d3   :  { %735 = vrcp.f32 %v332_v15 }
 0x1dd   :  { %v730_v17 = vpop.eup %729 }
 0x1de   :  { %v732_v18 = vpop.eup %731  ;;  %v347_v19 = vmul.f32 %v730_v17, %v317_v4 }
 0x1df   :  { %v734_v20 = vpop.eup %733  ;;  %v345_v23 = vmul.f32 %v732_v18, %v307_v61  ;;  %v501_v61 = vld [vmem:[%s933_s7] sm:$0x1] }
 0x1e0   :  { %v346_v21 = vmul.f32 %v734_v20, %v312_v7  ;;  %674 = vmatprep.subr.mxu0 %v347_v19  ;;  %v736_v22 = vpop.eup %735 }
 0x1e1   :  { %675 = vmatpush3.msra.mxu0 %v347_v19  ;;  %v344_v24 = vmul.f32 %v736_v22, %v302_v1  ;;  %v506_v1 = vpop.permute.xlu0 %505 }
 0x1e2   :  { %676 = vmatprep.subr.mxu0 %v346_v21  ;;  %v511_v2 = vrot.slane %v506_v1, %v510_v0 }
 0x1e3   :  { %677 = vmatpush3.msra.mxu0 %v346_v21 }
 0x1e4   :  { %678 = vmatprep.subr.mxu0 %v345_v23 }
 0x1e5   :  { %679 = vmatpush3.msra.mxu0 %v345_v23 }
 0x1e6   :  { %680 = vmatprep.subr.mxu0 %v344_v24 }
 0x1e7   :  { %681 = vmatpush3.msra.mxu0 %v344_v24 }
 0x1e8   :  { %683 = vmatmul.mubr.msk.f32.vlgmr.msra.gmra.mxu0 %vm222_vm2, %v349_v25 }
 0x1e9   :  { %685 = vmatprep.mubr.msk.f32.mxu0 %vm222_vm2, %v350_v26 }
 0x1ec   :  { %686 = vmatmul.mubr.msk.f32.gmra.mxu0 %vm222_vm2, %v351_v27 }
 0x2a8   :  { %v684_v32 = vpop.f32.mrf.mxu0 }
 0x2a9   :  { %v460_v33 = vadd.f32 %v684_v32, %v364_v31 }
 0x2aa   :  { %v454_v35 = vpop.f32.mrf.mxu0 }
 0x2ab   :  { %v622_v36 = vmul.f32 -1.442695, %v460_v33  ;;  %v455_v37 = vadd.f32 %v454_v35, %v359_v34 }
 0x2ac   :  { %v687_v38 = vpop.f32.mrf.mxu0 }
 0x2ad   :  { %v621_v39 = vmul.f32 -1.442695, %v455_v37  ;;  %v470_v40 = vadd.f32 %v687_v38, %v374_v29  ;;  %737 = vpow2.f32 %v622_v36 }
 0x2ae   :  { %v464_v41 = vpop.f32.mrf.mxu0 }
 0x2af   :  { %v624_v42 = vmul.f32 -1.442695, %v470_v40  ;;  %v465_v43 = vadd.f32 %v464_v41, %v369_v30  ;;  %739 = vpow2.f32 %v621_v39 }
 0x2b1   :  { %741 = vpow2.f32 %v624_v42  ;;  %v623_v44 = vmul.f32 -1.442695, %v465_v43 }
 0x2b3   :  { %743 = vpow2.f32 %v623_v44 }
 0x2ba   :  { %v738_v45 = vpop.eup %737 }
 0x2bb   :  { %v486_v48 = vadd.f32 1.0, %v738_v45 }
 0x2bc   :  { %v740_v46 = vpop.eup %739 }
 0x2bd   :  { %v485_v51 = vadd.f32 1.0, %v740_v46 }
 0x2be   :  { %v742_v47 = vpop.eup %741 }
 0x2bf   :  { %v488_v49 = vadd.f32 1.0, %v742_v47 }
 0x2c0   :  { %v744_v50 = vpop.eup %743 }
 0x2c1   :  { %745 = vrcp.f32 %v488_v49  ;;  %v487_v52 = vadd.f32 1.0, %v744_v50 }
 0x2c2   :  { %747 = vrcp.f32 %v486_v48 }
 0x2c3   :  { %749 = vrcp.f32 %v487_v52 }
 0x2c4   :  { %751 = vrcp.f32 %v485_v51 }
 0x2ce   :  { %v746_v53 = vpop.eup %745 }
 0x2cf   :  { %v748_v54 = vpop.eup %747  ;;  %v500_v55 = vmul.f32 %v746_v53, %v470_v40 }
 0x2d0   :  { %v750_v56 = vpop.eup %749  ;;  %v498_v59 = vmul.f32 %v748_v54, %v460_v33 }
 0x2d1   :  { %v499_v57 = vmul.f32 %v750_v56, %v465_v43  ;;  %689 = vmatpush3.msra.mxu1 %v500_v55  ;;  %v752_v58 = vpop.eup %751 }
 0x2d2   :  { %690 = vmatprep.subr.mxu1 %v776_v28  ;;  %v497_v60 = vmul.f32 %v752_v58, %v455_v37 }
 0x2d3   :  { %691 = vmatpush3.msra.mxu1 %v499_v57 }
 0x2d4   :  { %692 = vmatprep.subr.mxu1 %v776_v28 }
 0x2d5   :  { %693 = vmatpush3.msra.mxu1 %v498_v59 }
 0x2d6   :  { %694 = vmatprep.subr.mxu1 %v776_v28 }
 0x2d7   :  { %695 = vmatpush3.msra.mxu1 %v497_v60 }
 0x2d8   :  { %697 = vmatmul.mubr.msk.f32.vlgmr.msra.gmra.mxu1 %vm222_vm2, %v501_v61 }
 0x398   :  { %v581_v3 = vpop.f32.mrf.mxu1 }
 0x399   :  { %v582_v4 = vadd.f32 %v581_v3, %v511_v2 }
 0x39a   :  { %v698_v5 = vpop.f32.mrf.mxu1 }
 0x39b   :  { %585 = vst [vmem:[#allocation3] sm:$0x1] %v582_v4 }
 0x39c   :  { %764 = shalt.err (!%p761_p4)
}
 0x39d   :  { %595 = dma.vmem_to_hbm [thread:$0]  %s593_s2, 16, %s935_s9, [#allocation4]  }
 0x39e   :  { %773 = dma.done.wait [#allocation4], 16  }
 0x39f   :  { %774 = vsyncadd [#allocation4], 4294967280 }
 0x3a0   :  { %599 = vsyncpa [#allocation4], 1 }

</bundles_post_ra>
